<compile_context>
chip_gen: v7x
topology: tpu7x:2x2x1
jax: 0.10.0
libtpu: 0.0.40
codegen_flags: <defaults>
</compile_context>

<pallas_src>
import numpy as np
import jax
import jax.numpy as jnp
from jax.experimental import pallas as pl
from jax.experimental.pallas import tpu as pltpu

_TORCH_PAIRWISE_EPS = 1e-6  # torch.pairwise_distance default eps (added to the diff)

# Fused per-row output slab (lane axis): col 0 = hinge loss, col 1 = d(anchor,
# positive), col 2 = d(anchor, negative), cols 3..7 = zero padding.
_OUT_COLS = 8
_LANE = 128


def _triplet_kernel(margin_ref, a_ref, p_ref, n_ref, out_ref):
    # Cast in-VMEM right after load (portable: v5e VPU has no bf16).
    a = a_ref[...].astype(jnp.float32)
    p = p_ref[...].astype(jnp.float32)
    n = n_ref[...].astype(jnp.float32)
    margin = margin_ref[0]

    # torch.pairwise_distance: ||x1 - x2 + eps||_2 along the feature axis.
    dpos = jnp.sqrt(
        jnp.sum((a - p + _TORCH_PAIRWISE_EPS) ** 2, axis=-1, keepdims=True))
    dneg = jnp.sqrt(
        jnp.sum((a - n + _TORCH_PAIRWISE_EPS) ** 2, axis=-1, keepdims=True))
    losses = jnp.maximum(margin + dpos - dneg, 0.0)

    # Pack the three per-row values into one slab -> one writeback DMA per tile.
    col = jax.lax.broadcasted_iota(jnp.int32, out_ref.shape, 1)
    slab = jnp.where(col == 0, losses,
                     jnp.where(col == 1, dpos,
                               jnp.where(col == 2, dneg, 0.0)))
    out_ref[...] = slab.astype(out_ref.dtype)


def _round_up(x, m):
    return ((x + m - 1) // m) * m


def _round_down_mult8(x):
    return (x // 8) * 8


def _vmem_config():
    """Returns (per-tile working-set budget, vmem_limit_bytes), generation-aware."""
    vmem_cap = None
    try:
        info = pltpu.get_tpu_info()
        vmem_cap = getattr(info, "vmem_capacity_bytes", None)
    except Exception:
        vmem_cap = None
    if vmem_cap is None:
        vmem_cap = 64 * 1024 * 1024  # conservative: assume v7x (64 MiB / TC)
    if vmem_cap >= 128 * 1024 * 1024:
        # v5e / v6e: 128 MiB physical VMEM -> bigger tiles, raise the scoped limit.
        return 20 * 1024 * 1024, 64 * 1024 * 1024
    # v7x: 64 MiB physical VMEM per TensorCore.
    return 8 * 1024 * 1024, 32 * 1024 * 1024


def _choose_block_rows(B, D, itemsize, vmem_budget):
    """Batch-tile height: fill the VMEM budget, lane-padding aware, multiple of 8.

    Per row accounting:
      * 3 inputs x 2 pipeline buffers at the NATIVE itemsize,
      * ~3 f32 temporaries for the in-kernel casts / diffs / squares,
      * the fused (tb, 8) output slab (lane-padded to 128) x 2 buffers,
    all with D rounded up to the 128-lane tile width.
    """
    d_pad = _round_up(max(D, 1), _LANE)
    bytes_per_row = (
        6 * d_pad * int(itemsize)   # input double buffers, native dtype
        + 3 * d_pad * 4             # in-kernel f32 temporaries
        + 2 * _LANE * 4             # output slab double buffer (lane padded)
    )
    tb = vmem_budget // max(bytes_per_row, 1)
    tb = max(8, _round_down_mult8(tb))
    # TODO(synk): for pathologically wide D where even tb=8 rows overflow the
    # VMEM limit, add a second "arbitrary" grid axis over D that accumulates
    # partial sum-of-squares in a VMEM scratch and finalizes on the last step.
    if tb >= B:
        if B >= 1024:
            # Keep >= 2 grid steps so v7x can shard the batch across its two
            # TensorCores and input DMAs overlap with compute.
            tb = max(8, _round_down_mult8(B // 2))
        else:
            return B  # single tile covering the whole (small) batch
    return tb


def triplet_loss_with_intermediates_pallas(anchor, positive, negative, margin,
                                           detach_intermediates=True,
                                           block_rows=None):
    assert anchor.shape == positive.shape == negative.shape
    assert anchor.ndim == 2
    B, D = anchor.shape

    vmem_budget, vmem_limit = _vmem_config()

    if block_rows is None:
        tb = _choose_block_rows(B, D, jnp.dtype(anchor.dtype).itemsize, vmem_budget)
    else:
        tb = int(block_rows)
        if tb >= B:
            tb = B
        else:
            # Blocks that don't span the full batch must be a multiple of 8 rows.
            tb = max(8, _round_down_mult8(tb))
            tb = min(tb, B)
    grid = (pl.cdiv(B, tb),)

    # Scalar-prefetch margin (SMEM) is positional arg 0; index_maps receive it
    # as a trailing ref argument.
    in_spec = pl.BlockSpec((tb, D), lambda i, m: (i, 0))
    out_spec = pl.BlockSpec((tb, _OUT_COLS), lambda i, m: (i, 0))

    margin_arr = jnp.asarray([margin], dtype=jnp.float32)

    out = pl.pallas_call(
        _triplet_kernel,
        out_shape=jax.ShapeDtypeStruct((B, _OUT_COLS), jnp.float32),
        grid_spec=pltpu.PrefetchScalarGridSpec(
            num_scalar_prefetch=1,
            grid=grid,
            in_specs=[in_spec, in_spec, in_spec],
            out_specs=out_spec,
        ),
        compiler_params=pltpu.CompilerParams(
            dimension_semantics=("parallel",),   # no cross-step carry -> megacore-splittable
            vmem_limit_bytes=vmem_limit,
        ),
    )(margin_arr, anchor, positive, negative)

    losses = out[:, 0]
    pos_d = out[:, 1]
    neg_d = out[:, 2]
    # Global mean outside the kernel: reducing B scalars in XLA is negligible
    # and keeps the batch grid axis fully parallel.
    loss = jnp.mean(losses)

    if detach_intermediates:
        # mirrors torch's .detach().cpu().numpy() with ONE batched D2H transfer
        losses, pos_d, neg_d = jax.device_get((losses, pos_d, neg_d))

    return loss, losses, pos_d, neg_d


class TripletLossWithIntermediates:
    """Triplet loss which also returns the loss and distances per triplet."""

    def __init__(self, margin: float, detach_intermediates: bool = True):
        self.margin = margin
        self.detach_intermediates = detach_intermediates

    def __call__(self, anchor, positive, negative):
        return triplet_loss_with_intermediates_pallas(
            anchor, positive, negative, self.margin, self.detach_intermediates
        )


def _reference(anchor, positive, negative, margin):
    eps = _TORCH_PAIRWISE_EPS
    a = anchor.astype(jnp.float32)
    p = positive.astype(jnp.float32)
    n = negative.astype(jnp.float32)
    pos = jnp.sqrt(jnp.sum((a - p + eps) ** 2, axis=-1))
    neg = jnp.sqrt(jnp.sum((a - n + eps) ** 2, axis=-1))
    losses = jnp.maximum(margin + pos - neg, 0.0)
    return jnp.mean(losses), losses, pos, neg


if __name__ == "__main__":
    margin = 0.5
    root = jax.random.PRNGKey(0)

    # ---- small case: single tile (block covers full batch) ----
    B, D = 8, 32
    ka, kp, kn, k2 = jax.random.split(root, 4)
    anchor = jax.random.normal(ka, (B, D), dtype=jnp.float32)
    positive = jax.random.normal(kp, (B, D), dtype=jnp.float32)
    negative = jax.random.normal(kn, (B, D), dtype=jnp.float32)

    mod = TripletLossWithIntermediates(margin, detach_intermediates=True)
    loss, losses, pos_d, neg_d = mod(anchor, positive, negative)
    jax.block_until_ready(loss)

    ref_loss, ref_losses, ref_pos, ref_neg = _reference(anchor, positive, negative, margin)
    np.testing.assert_allclose(np.asarray(loss), np.asarray(ref_loss), rtol=1e-5, atol=1e-5)
    np.testing.assert_allclose(np.asarray(losses), np.asarray(ref_losses), rtol=1e-5, atol=1e-5)
    np.testing.assert_allclose(np.asarray(pos_d), np.asarray(ref_pos), rtol=1e-5, atol=1e-5)
    np.testing.assert_allclose(np.asarray(neg_d), np.asarray(ref_neg), rtol=1e-5, atol=1e-5)

    # ---- multi-tile case: pipelined grid, partial last tile, and user
    # block_rows that must be rounded down to a multiple of 8 (100 -> 96) ----
    B2, D2 = 300, 32
    k2a, k2p, k2n = jax.random.split(k2, 3)
    a2 = jax.random.normal(k2a, (B2, D2), dtype=jnp.float32)
    p2 = jax.random.normal(k2p, (B2, D2), dtype=jnp.float32)
    n2 = jax.random.normal(k2n, (B2, D2), dtype=jnp.float32)

    loss2, losses2, pos2, neg2 = triplet_loss_with_intermediates_pallas(
        a2, p2, n2, margin, detach_intermediates=False, block_rows=100)
    jax.block_until_ready(loss2)

    r_loss2, r_losses2, r_pos2, r_neg2 = _reference(a2, p2, n2, margin)
    np.testing.assert_allclose(np.asarray(loss2), np.asarray(r_loss2), rtol=1e-5, atol=1e-5)
    np.testing.assert_allclose(np.asarray(losses2), np.asarray(r_losses2), rtol=1e-5, atol=1e-5)
    np.testing.assert_allclose(np.asarray(pos2), np.asarray(r_pos2), rtol=1e-5, atol=1e-5)
    np.testing.assert_allclose(np.asarray(neg2), np.asarray(r_neg2), rtol=1e-5, atol=1e-5)

    # ---- auto-tiled multi-step case (default block_rows path) ----
    B3, D3 = 2048, 64
    k3a, k3p, k3n = jax.random.split(jax.random.fold_in(root, 7), 3)
    a3 = jax.random.normal(k3a, (B3, D3), dtype=jnp.float32)
    p3 = jax.random.normal(k3p, (B3, D3), dtype=jnp.float32)
    n3 = jax.random.normal(k3n, (B3, D3), dtype=jnp.float32)

    loss3, losses3, pos3, neg3 = triplet_loss_with_intermediates_pallas(
        a3, p3, n3, margin, detach_intermediates=False)
    jax.block_until_ready(loss3)

    r_loss3, r_losses3, r_pos3, r_neg3 = _reference(a3, p3, n3, margin)
    np.testing.assert_allclose(np.asarray(loss3), np.asarray(r_loss3), rtol=1e-5, atol=1e-5)
    np.testing.assert_allclose(np.asarray(losses3), np.asarray(r_losses3), rtol=1e-5, atol=1e-5)
    np.testing.assert_allclose(np.asarray(pos3), np.asarray(r_pos3), rtol=1e-5, atol=1e-5)
    np.testing.assert_allclose(np.asarray(neg3), np.asarray(r_neg3), rtol=1e-5, atol=1e-5)

    print("KERNEL_OK")
</pallas_src>

<mosaic_0001>
module attributes {stable_mosaic.version = 11 : i64} {
  func.func @_triplet_kernel(%arg0: i32, %arg1: memref<1xf32, #tpu.memory_space<smem>>, %arg2: memref<8x32xf32, #tpu.memory_space<vmem>>, %arg3: memref<8x32xf32, #tpu.memory_space<vmem>>, %arg4: memref<8x32xf32, #tpu.memory_space<vmem>>, %arg5: memref<8x8xf32, #tpu.memory_space<vmem>>) attributes {dimension_semantics = [#tpu.dimension_semantics<parallel>], iteration_bounds = array<i64: 1>, scalar_prefetch = 1 : i64, scratch_operands = 0 : i64, tpu.core_type = #tpu.core_type<tc>, window_params = [{transform_indices = @transform_0, window_bounds = array<i64: 8, 32>}, {transform_indices = @transform_1, window_bounds = array<i64: 8, 32>}, {transform_indices = @transform_2, window_bounds = array<i64: 8, 32>}, {transform_indices = @transform_3, window_bounds = array<i64: 8, 8>}]} {
    %c0 = arith.constant 0 : index
    %c0_0 = arith.constant 0 : index
    %0 = vector.load %arg2[%c0, %c0_0] : memref<8x32xf32, #tpu.memory_space<vmem>>, vector<8x32xf32>
    %c0_1 = arith.constant 0 : index
    %c0_2 = arith.constant 0 : index
    %1 = vector.load %arg3[%c0_1, %c0_2] : memref<8x32xf32, #tpu.memory_space<vmem>>, vector<8x32xf32>
    %c0_3 = arith.constant 0 : index
    %c0_4 = arith.constant 0 : index
    %2 = vector.load %arg4[%c0_3, %c0_4] : memref<8x32xf32, #tpu.memory_space<vmem>>, vector<8x32xf32>
    %c0_5 = arith.constant 0 : index
    %3 = memref.load %arg1[%c0_5] : memref<1xf32, #tpu.memory_space<smem>>
    %4 = arith.subf %0, %1 : vector<8x32xf32>
    %cst = arith.constant 9.99999997E-7 : f32
    %5 = vector.broadcast %cst : f32 to vector<8x32xf32>
    %6 = arith.addf %4, %5 : vector<8x32xf32>
    %7 = arith.mulf %6, %6 : vector<8x32xf32>
    %cst_6 = arith.constant dense<0.000000e+00> : vector<8xf32>
    %8 = vector.multi_reduction <add>, %7, %cst_6 [1] : vector<8x32xf32> to vector<8xf32>
    %9 = vector.shape_cast %8 : vector<8xf32> to vector<8x1xf32>
    %10 = math.sqrt %9 : vector<8x1xf32>
    %11 = arith.subf %0, %2 : vector<8x32xf32>
    %cst_7 = arith.constant 9.99999997E-7 : f32
    %12 = vector.broadcast %cst_7 : f32 to vector<8x32xf32>
    %13 = arith.addf %11, %12 : vector<8x32xf32>
    %14 = arith.mulf %13, %13 : vector<8x32xf32>
    %cst_8 = arith.constant dense<0.000000e+00> : vector<8xf32>
    %15 = vector.multi_reduction <add>, %14, %cst_8 [1] : vector<8x32xf32> to vector<8xf32>
    %16 = vector.shape_cast %15 : vector<8xf32> to vector<8x1xf32>
    %17 = math.sqrt %16 : vector<8x1xf32>
    %18 = vector.broadcast %3 : f32 to vector<8x1xf32>
    %19 = arith.addf %18, %10 : vector<8x1xf32>
    %20 = arith.subf %19, %17 : vector<8x1xf32>
    %cst_9 = arith.constant 0.000000e+00 : f32
    %21 = vector.broadcast %cst_9 : f32 to vector<8x1xf32>
    %22 = arith.maximumf %20, %21 : vector<8x1xf32>
    %23 = tpu.iota {dimensions = array<i32: 1>} : vector<8x8xi32>
    %c0_i32 = arith.constant 0 : i32
    %24 = vector.broadcast %c0_i32 : i32 to vector<8x8xi32>
    %25 = arith.cmpi eq, %23, %24 : vector<8x8xi32>
    %c1_i32 = arith.constant 1 : i32
    %26 = vector.broadcast %c1_i32 : i32 to vector<8x8xi32>
    %27 = arith.cmpi eq, %23, %26 : vector<8x8xi32>
    %c2_i32 = arith.constant 2 : i32
    %28 = vector.broadcast %c2_i32 : i32 to vector<8x8xi32>
    %29 = arith.cmpi eq, %23, %28 : vector<8x8xi32>
    %cst_10 = arith.constant 0.000000e+00 : f32
    %30 = vector.shape_cast %17 : vector<8x1xf32> to vector<8x1xf32>
    %31 = vector.broadcast %30 : vector<8x1xf32> to vector<8x8xf32>
    %32 = vector.broadcast %cst_10 : f32 to vector<8x8xf32>
    %33 = arith.select %29, %31, %32 : vector<8x8xi1>, vector<8x8xf32>
    %34 = vector.shape_cast %10 : vector<8x1xf32> to vector<8x1xf32>
    %35 = vector.broadcast %34 : vector<8x1xf32> to vector<8x8xf32>
    %36 = arith.select %27, %35, %33 : vector<8x8xi1>, vector<8x8xf32>
    %37 = vector.shape_cast %22 : vector<8x1xf32> to vector<8x1xf32>
    %38 = vector.broadcast %37 : vector<8x1xf32> to vector<8x8xf32>
    %39 = arith.select %25, %38, %36 : vector<8x8xi1>, vector<8x8xf32>
    %c0_11 = arith.constant 0 : index
    %c0_12 = arith.constant 0 : index
    %40 = vector.load %arg5[%c0_11, %c0_12] : memref<8x8xf32, #tpu.memory_space<vmem>>, vector<8x8xf32>
    tpu.vector_store %arg5[%c0_11, %c0_12], %39 {strides = array<i32>} : memref<8x8xf32, #tpu.memory_space<vmem>>, vector<8x8xf32>,
    return
  }
  func.func @transform_0(%arg0: i32, %arg1: memref<1xf32, #tpu.memory_space<smem>>) -> (i32, i32) {
    %c0_i32 = arith.constant 0 : i32
    %c0_i32_0 = arith.constant 0 : i32
    return %arg0, %c0_i32 : i32, i32
  }
  func.func @transform_1(%arg0: i32, %arg1: memref<1xf32, #tpu.memory_space<smem>>) -> (i32, i32) {
    %c0_i32 = arith.constant 0 : i32
    %c0_i32_0 = arith.constant 0 : i32
    return %arg0, %c0_i32 : i32, i32
  }
  func.func @transform_2(%arg0: i32, %arg1: memref<1xf32, #tpu.memory_space<smem>>) -> (i32, i32) {
    %c0_i32 = arith.constant 0 : i32
    %c0_i32_0 = arith.constant 0 : i32
    return %arg0, %c0_i32 : i32, i32
  }
  func.func @transform_3(%arg0: i32, %arg1: memref<1xf32, #tpu.memory_space<smem>>) -> (i32, i32) {
    %c0_i32 = arith.constant 0 : i32
    %c0_i32_0 = arith.constant 0 : i32
    return %arg0, %c0_i32 : i32, i32
  }
}

</mosaic_0001>

<bundles_post_ra>
// kernel: tpu_custom_call.1
= control target key start
LH: loop header
LB: loop body
LE: loop exit
PB: predicated region body
PF: predicated region fallthrough
CT: control target
= control target key end

     0   :  { %10 = vsyncpa [#allocation5], 0  ;;  %s251_s0 = inlined_call_operand.<no memory space> [shape: f32[1], index: 0, kind: input, shape index: {}]   ;;  %s252_s1 = inlined_call_operand.hbm [shape: f32[8,32], index: 1, kind: input, shape index: {}]   ;;  %s253_s2 = inlined_call_operand.hbm [shape: f32[8,32], index: 2, kind: input, shape index: {}]   ;;  %s254_s3 = inlined_call_operand.vmem [shape: f32[8,32], index: 3, kind: input, shape index: {}]   ;;  %s255_s4 = inlined_call_operand.hbm [shape: f32[8,8], index: 4, kind: output, shape index: {}]  }
   0x1   :  { %11 = vsyncpa [#allocation8], 0 }
   0x2   :  { %12 = vsyncpa [#allocation6], 0  ;;  %s181_s15 = smov [#allocation4]   ;;  %s182_s17 = smov [#allocation7]  }
   0x3   :  { %s19_s16 = sshll.u32 %s181_s15, 4  ;;  %s29_s18 = sshll.u32 %s182_s17, 4  ;;  %s20_s16 = int_to_ptr.vmem [resolvable:$true] %s19_s16  ;;  %s30_s18 = int_to_ptr.vmem [resolvable:$true] %s29_s18 }
   0x4   :  { %s109_s21 = scalar_lea.hbm %s252_s1, 128 }
   0x5   :  { %p110_p0 = scmp.ne.s32.totalorder %s252_s1, %s109_s21  ;;  %p113_p1 = scmp.lt.u32.totalorder %s109_s21, %s252_s1 }
   0x7   :  { %p115_p2 = pnand %p113_p1, %p110_p0 }
   0x9   :  { %118 = shalt.err (!%p115_p2)
}
   0xa   :  { %s119_s26 = scalar_lea.vmem %s20_s16, 128  ;;  %p124_p4 = scmp.lt.s32.totalorder %s20_s16, %s20_s16 }
   0xb   :  { %p120_p3 = scmp.ne.s32.totalorder %s20_s16, %s119_s26  ;;  %p125_p5 = scmp.lt.s32.totalorder %s119_s26, %s119_s26 }
   0xd   :  { %p126_p6 = por %p125_p5, %p124_p4 }
   0xf   :  { %p127_p7 = pnand %p126_p6, %p120_p3 }
  0x11   :  { %130 = shalt.err (!%p127_p7)
}
  0x12   :  { %22 = dma.hbm_to_vmem [thread:$0]  %s252_s1, 128, %s20_s16, [#allocation5]  }
  0x13   :  { %s131_s5 = scalar_lea.hbm %s253_s2, 128 }
  0x14   :  { %p132_p8 = scmp.ne.s32.totalorder %s253_s2, %s131_s5  ;;  %p135_p9 = scmp.lt.u32.totalorder %s131_s5, %s253_s2 }
  0x16   :  { %p137_p10 = pnand %p135_p9, %p132_p8 }
  0x18   :  { %140 = shalt.err (!%p137_p10)
}
  0x19   :  { %s141_s10 = scalar_lea.vmem %s30_s18, 128  ;;  %p146_p12 = scmp.lt.s32.totalorder %s30_s18, %s30_s18 }
  0x1a   :  { %p142_p11 = scmp.ne.s32.totalorder %s30_s18, %s141_s10  ;;  %p147_p13 = scmp.lt.s32.totalorder %s141_s10, %s141_s10 }
  0x1c   :  { %p148_p0 = por %p147_p13, %p146_p12 }
  0x1e   :  { %p149_p1 = pnand %p148_p0, %p142_p11 }
  0x20   :  { %152 = shalt.err (!%p149_p1)
}
  0x21   :  { %32 = dma.hbm_to_vmem [thread:$0]  %s253_s2, 128, %s30_s18, [#allocation8]  }
  0x22   :  { %175 = dma.done.wait [#allocation5], 128  }
  0x23   :  { %176 = vsyncadd [#allocation5], 4294967168 }
  0x24   :  { %177 = dma.done.wait [#allocation8], 128  }
  0x25   :  { %178 = vsyncadd [#allocation8], 4294967168  ;;  %v41_v0 = vld [vmem:[#allocation4] sm:$0xff]  ;;  %v42_v1 = vld [vmem:[#allocation7] sm:$0xff]  ;;  %vm48_vm0 = vcmask 261120   ;;  %v76_v13 = vlaneseq  ;;  %v72_v21 = vstv %s251_s0  ;;  %s183_s14 = smov [#allocation9]  }
  0x26   :  { %v43_v2 = vld [vmem:[%s254_s3] sm:$0xff]  ;;  %v45_v3 = vsub.f32 %v41_v0, %v42_v1  ;;  %s92_s15 = sshll.u32 %s183_s14, 4  ;;  %vm84_vm8 = vcmask 64512   ;;  %s93_s15 = int_to_ptr.vmem [resolvable:$true] %s92_s15 }
  0x27   :  { %v59_v4 = vsub.f32 %v41_v0, %v43_v2  ;;  %v77_v17 = vand.u32 127, %v76_v13  ;;  %s153_s0 = scalar_lea.vmem %s93_s15, 128  ;;  %p158_p3 = scmp.lt.s32.totalorder %s93_s15, %s93_s15 }
  0x28   :  { %v46_v5 = vadd.f32 1e-06, %v45_v3  ;;  %p154_p2 = scmp.ne.s32.totalorder %s93_s15, %s153_s0  ;;  %p159_p4 = scmp.lt.s32.totalorder %s153_s0, %s153_s0 }
  0x29   :  { %v60_v6 = vadd.f32 1e-06, %v59_v4  ;;  %vm80_vm4 = vcmp.eq.s32.totalorder %v77_v17, 2  ;;  %vm79_vm6 = vcmp.eq.s32.totalorder %v77_v17, 1  ;;  %vm78_vm7 = vcmp.eq.s32.totalorder %v77_v17, 0 }
  0x2a   :  { %v47_v7 = vmul.f32 %v46_v5, %v46_v5  ;;  %p160_p5 = por %p159_p4, %p158_p3 }
  0x2b   :  { %v61_v8 = vmul.f32 %v60_v6, %v60_v6 }
  0x2c   :  { %v49_v9 = vsel %vm48_vm0, %v47_v7, 0.0  ;;  %p161_p6 = pnand %p160_p5, %p154_p2 }
  0x2d   :  { %50 = vadd.xlane.f32.xlu0 %v49_v9  ;;  %v62_v10 = vsel %vm48_vm0, %v61_v8, 0.0 }
  0x31   :  { %63 = vadd.xlane.f32.xlu0 %v62_v10 }
  0xba   :  { %v51_v11 = vpop.xlane.xlu0 %50 }
  0xbb   :  { %105 = vrsqrt.f32 %v51_v11  ;;  %vm54_vm1 = vcmp.eq.f32.partialorder %v51_v11, inf  ;;  %v57_v16 = vand.u32 2147483648, %v51_v11  ;;  %vm56_vm2 = vcmp.eq.f32.partialorder %v51_v11, 0.0 }
  0xbe   :  { %v64_v12 = vpop.xlane.xlu0 %63 }
  0xbf   :  { %107 = vrsqrt.f32 %v64_v12  ;;  %vm67_vm3 = vcmp.eq.f32.partialorder %v64_v12, inf  ;;  %v70_v23 = vand.u32 2147483648, %v64_v12  ;;  %vm69_vm5 = vcmp.eq.f32.partialorder %v64_v12, 0.0 }
  0xc5   :  { %v106_v14 = vpop.eup %105 }
  0xc6   :  { %v53_v15 = vmul.f32 %v106_v14, %v51_v11 }
  0xc8   :  { %v55_v18 = vsel %vm54_vm1, %v51_v11, %v53_v15 }
  0xc9   :  { %v108_v19 = vpop.eup %107  ;;  %v58_v20 = vsel %vm56_vm2, %v57_v16, %v55_v18 }
  0xca   :  { %v66_v22 = vmul.f32 %v108_v19, %v64_v12  ;;  %v73_v25 = vadd.f32 %v72_v21, %v58_v20 }
  0xcc   :  { %v68_v24 = vsel %vm67_vm3, %v64_v12, %v66_v22 }
  0xcd   :  { %v71_v26 = vsel %vm69_vm5, %v70_v23, %v68_v24 }
  0xce   :  { %v74_v27 = vsub.f32 %v73_v25, %v71_v26  ;;  %v81_v28 = vsel %vm80_vm4, %v71_v26, 0.0 }
  0xcf   :  { %v82_v30 = vsel %vm79_vm6, %v58_v20, %v81_v28 }
  0xd0   :  { %v75_v29 = vmax.f32 %v74_v27, 0.0 }
  0xd2   :  { %v83_v31 = vsel %vm78_vm7, %v75_v29, %v82_v30 }
  0xd3   :  { %85 = vst.msk [vmem:[#allocation9] sm:$0xff] %vm84_vm8, %v83_v31 }
  0xd4   :  { %164 = shalt.err (!%p161_p6)
}
  0xd5   :  { %s165_s18 = scalar_lea.hbm %s255_s4, 128 }
  0xd6   :  { %p166_p7 = scmp.ne.s32.totalorder %s255_s4, %s165_s18  ;;  %p169_p8 = scmp.lt.u32.totalorder %s165_s18, %s255_s4 }
  0xd8   :  { %p171_p9 = pnand %p169_p8, %p166_p7 }
  0xda   :  { %174 = shalt.err (!%p171_p9)
}
  0xdb   :  { %95 = dma.vmem_to_hbm [thread:$0]  %s93_s15, 128, %s255_s4, [#allocation6]  }
  0xdc   :  { %179 = dma.done.wait [#allocation6], 128  }
  0xdd   :  { %180 = vsyncadd [#allocation6], 4294967168 }
  0xde   :  { %99 = vsyncpa [#allocation5], 1 }
  0xdf   :  { %100 = vsyncpa [#allocation8], 1 }
  0xe0   :  { %101 = vsyncpa [#allocation6], 1 }

</bundles_post_ra>
